<compile_context>
chip_gen: v6e
topology: v6e:2x2x1
jax: 0.10.0
libtpu: 0.0.40
codegen_flags: <defaults>
</compile_context>

<pallas_src>
import jax
import jax.numpy as jnp
from jax.experimental import pallas as pl
from jax.experimental.pallas import tpu as pltpu

LANE = 128


def _round_up(v, m):
    return (v + m - 1) // m * m


def _mlp_kernel(x_ref, w1_ref, b1_ref, w2_ref, b2_ref, w3_ref, b3_ref,
                wh_ref, bh_ref, o_ref):
    # x arrives in f32; cast to bf16 on the VPU (free filler under the
    # MXU/DMA bound) instead of burning an extra HBM pass in the wrapper.
    x = x_ref[...].astype(jnp.bfloat16)
    # 4 matmuls (bf16 in, f32 acc on the MXU) + bias + ReLU on the f32 acc.
    h = jnp.dot(x, w1_ref[...], preferred_element_type=jnp.float32)
    h = jnp.maximum(h + b1_ref[...], 0.0).astype(jnp.bfloat16)
    h = jnp.dot(h, w2_ref[...], preferred_element_type=jnp.float32)
    h = jnp.maximum(h + b2_ref[...], 0.0).astype(jnp.bfloat16)
    h = jnp.dot(h, w3_ref[...], preferred_element_type=jnp.float32)
    h = jnp.maximum(h + b3_ref[...], 0.0).astype(jnp.bfloat16)
    out = jnp.dot(h, wh_ref[...], preferred_element_type=jnp.float32) + bh_ref[...]
    o_ref[...] = out.astype(o_ref.dtype)


def init_params(key, in_units, hidden, out_dim):
    """f32 init mimicking nn.Linear's U(-1/sqrt(fan_in), 1/sqrt(fan_in)).
    Weights stored as (in_features, out_features); biases as (1, out_features)."""
    def linear(k, fan_in, fan_out):
        kw, kb = jax.random.split(k)
        bound = 1.0 / (fan_in ** 0.5)
        w = jax.random.uniform(kw, (fan_in, fan_out), jnp.float32, -bound, bound)
        b = jax.random.uniform(kb, (1, fan_out), jnp.float32, -bound, bound)
        return w, b

    k1, k2, k3, k4 = jax.random.split(key, 4)
    w1, b1 = linear(k1, in_units, hidden)
    w2, b2 = linear(k2, hidden, hidden)
    w3, b3 = linear(k3, hidden, hidden)
    wh, bh = linear(k4, hidden, out_dim)
    return dict(w1=w1, b1=b1, w2=w2, b2=b2, w3=w3, b3=b3, wh=wh, bh=bh)


def prepare_params(params, out_dim):
    """Cast weights to bf16 (device-resident, done once) and pad the head to a
    lane-dense 128-wide output. Biases stay f32 (added to the f32 accumulator)."""
    hidden = params["w2"].shape[0]
    n_pad = _round_up(max(out_dim, LANE), LANE)   # keep at exactly 128 for out_dim<=128
    wh = jnp.zeros((hidden, n_pad), jnp.float32).at[:, :out_dim].set(params["wh"])
    bh = jnp.zeros((1, n_pad), jnp.float32).at[:, :out_dim].set(params["bh"])
    return dict(
        w1=params["w1"].astype(jnp.bfloat16),
        w2=params["w2"].astype(jnp.bfloat16),
        w3=params["w3"].astype(jnp.bfloat16),
        wh=wh.astype(jnp.bfloat16),
        b1=params["b1"], b2=params["b2"], b3=params["b3"], bh=bh,
    )


def _pick_tile_b(B):
    # Small batch: one grid step, rounded up to the bf16-native 16-row packing.
    if B <= 128:
        return _round_up(B, 16)
    # Large batch: bigger tiles amortize the ~0.35 us per-grid-step overhead,
    # but always keep >= 2 grid steps so v7x's second TensorCore has work.
    return 256 if B >= 512 else 128


def mlp_forward(x, p, out_dim):
    """x: (B, C, H, W) or (B, D) f32.  p: prepare_params() output.
    Returns (B, out_dim) f32."""
    B = x.shape[0]
    x_flat = x.reshape(B, -1)          # same order as torch x.view(B, -1); stays f32
    D = x_flat.shape[1]
    hidden = p["w2"].shape[0]
    n_pad = p["wh"].shape[1]

    tile_b = _pick_tile_b(B)
    b_pad = _round_up(B, tile_b)
    if b_pad != B:                     # skip the pad pass when B already tiles cleanly
        x_flat = jnp.pad(x_flat, ((0, b_pad - B), (0, 0)))
    grid = (b_pad // tile_b,)

    const2 = lambda i: (0, 0)   # weights/biases: same block every step -> VMEM-resident
    in_specs = [
        pl.BlockSpec((tile_b, D), lambda i: (i, 0)),   # x tile (f32, cast in-kernel)
        pl.BlockSpec((D, hidden), const2),             # w1 (bf16)
        pl.BlockSpec((1, hidden), const2),             # b1 (f32)
        pl.BlockSpec((hidden, hidden), const2),        # w2
        pl.BlockSpec((1, hidden), const2),             # b2
        pl.BlockSpec((hidden, hidden), const2),        # w3
        pl.BlockSpec((1, hidden), const2),             # b3
        pl.BlockSpec((hidden, n_pad), const2),         # wh (padded to 128 lanes)
        pl.BlockSpec((1, n_pad), const2),              # bh (padded)
    ]
    out_specs = pl.BlockSpec((tile_b, n_pad), lambda i: (i, 0))

    flops = 2 * b_pad * (D * hidden + 2 * hidden * hidden + hidden * n_pad)
    bytes_accessed = (
        b_pad * D * 4                                               # x (f32, read once)
        + (D * hidden + 2 * hidden * hidden + hidden * n_pad) * 2   # weights (bf16)
        + (3 * hidden + n_pad) * 4                                  # biases (f32)
        + b_pad * n_pad * 4                                         # output (f32)
    )

    out = pl.pallas_call(
        _mlp_kernel,
        out_shape=jax.ShapeDtypeStruct((b_pad, n_pad), jnp.float32),
        grid=grid,
        in_specs=in_specs,
        out_specs=out_specs,
        compiler_params=pltpu.CompilerParams(
            dimension_semantics=("parallel",)),       # megacore sharding on v7x
        cost_estimate=pl.CostEstimate(
            flops=flops, transcendentals=0, bytes_accessed=bytes_accessed),
    )(x_flat, p["w1"], p["b1"], p["w2"], p["b2"], p["w3"], p["b3"],
      p["wh"], p["bh"])

    return out[:B, :out_dim]


def mlp_reference(x, p, out_dim):
    """Pure-JAX reference using the same bf16-weight / f32-accumulation recipe."""
    h = x.reshape(x.shape[0], -1).astype(jnp.bfloat16)
    h = jnp.maximum(jnp.dot(h, p["w1"], preferred_element_type=jnp.float32)
                    + p["b1"], 0.0).astype(jnp.bfloat16)
    h = jnp.maximum(jnp.dot(h, p["w2"], preferred_element_type=jnp.float32)
                    + p["b2"], 0.0).astype(jnp.bfloat16)
    h = jnp.maximum(jnp.dot(h, p["w3"], preferred_element_type=jnp.float32)
                    + p["b3"], 0.0).astype(jnp.bfloat16)
    out = jnp.dot(h, p["wh"], preferred_element_type=jnp.float32) + p["bh"]
    return out[:, :out_dim]


if __name__ == "__main__":
    key = jax.random.PRNGKey(0)
    kx, kp = jax.random.split(key)

    # in_size = (4, 16, 16) -> in_units = 1024; out_size = (8,); hidden = 256
    B, C, H, W = 2, 4, 16, 16
    in_units = C * H * W
    hidden = 256
    out_dim = 8

    x = jax.random.normal(kx, (B, C, H, W), jnp.float32)
    params = init_params(kp, in_units, hidden, out_dim)
    prepared = prepare_params(params, out_dim)

    # jit the whole acting step so reshape/pad/pallas_call/slice fuse into one
    # dispatch (matters at the tiny-batch inference sizes).
    fwd = jax.jit(mlp_forward, static_argnames=("out_dim",))
    out = fwd(x, prepared, out_dim=out_dim)
    out = jax.block_until_ready(out)

    ref = mlp_reference(x, prepared, out_dim)
    assert out.shape == (B, out_dim), out.shape
    assert jnp.allclose(out, ref, atol=1e-2, rtol=1e-2), "mismatch vs reference"

    print("KERNEL_OK")
</pallas_src>

<mosaic_0001>
module attributes {stable_mosaic.version = 11 : i64} {
  func.func @_mlp_kernel(%arg0: i32, %arg1: memref<16x1024xf32, #tpu.memory_space<vmem>>, %arg2: memref<1024x256xbf16, #tpu.memory_space<vmem>>, %arg3: memref<1x256xf32, #tpu.memory_space<vmem>>, %arg4: memref<256x256xbf16, #tpu.memory_space<vmem>>, %arg5: memref<1x256xf32, #tpu.memory_space<vmem>>, %arg6: memref<256x256xbf16, #tpu.memory_space<vmem>>, %arg7: memref<1x256xf32, #tpu.memory_space<vmem>>, %arg8: memref<256x128xbf16, #tpu.memory_space<vmem>>, %arg9: memref<1x128xf32, #tpu.memory_space<vmem>>, %arg10: memref<16x128xf32, #tpu.memory_space<vmem>>) attributes {dimension_semantics = [#tpu.dimension_semantics<parallel>], iteration_bounds = array<i64: 1>, scalar_prefetch = 0 : i64, scratch_operands = 0 : i64, tpu.core_type = #tpu.core_type<tc>, window_params = [{transform_indices = @transform_0, window_bounds = array<i64: 16, 1024>}, {pipeline_mode = #tpu.pipeline_mode<synchronous>, transform_indices = @transform_1, window_bounds = array<i64: 1024, 256>}, {pipeline_mode = #tpu.pipeline_mode<synchronous>, transform_indices = @transform_2, window_bounds = array<i64: 1, 256>}, {pipeline_mode = #tpu.pipeline_mode<synchronous>, transform_indices = @transform_3, window_bounds = array<i64: 256, 256>}, {pipeline_mode = #tpu.pipeline_mode<synchronous>, transform_indices = @transform_4, window_bounds = array<i64: 1, 256>}, {pipeline_mode = #tpu.pipeline_mode<synchronous>, transform_indices = @transform_5, window_bounds = array<i64: 256, 256>}, {pipeline_mode = #tpu.pipeline_mode<synchronous>, transform_indices = @transform_6, window_bounds = array<i64: 1, 256>}, {pipeline_mode = #tpu.pipeline_mode<synchronous>, transform_indices = @transform_7, window_bounds = array<i64: 256, 128>}, {pipeline_mode = #tpu.pipeline_mode<synchronous>, transform_indices = @transform_8, window_bounds = array<i64: 1, 128>}, {transform_indices = @transform_9, window_bounds = array<i64: 16, 128>}]} {
    %c0 = arith.constant 0 : index
    %c0_0 = arith.constant 0 : index
    %0 = vector.load %arg1[%c0, %c0_0] : memref<16x1024xf32, #tpu.memory_space<vmem>>, vector<16x1024xf32>
    %1 = arith.truncf %0 : vector<16x1024xf32> to vector<16x1024xbf16>
    %c0_1 = arith.constant 0 : index
    %c0_2 = arith.constant 0 : index
    %2 = vector.load %arg2[%c0_1, %c0_2] : memref<1024x256xbf16, #tpu.memory_space<vmem>>, vector<1024x256xbf16>
    %cst = arith.constant dense<0.000000e+00> : vector<16x256xf32>
    %3 = tpu.matmul %1, %2, %cst {dimension_numbers = #tpu.dot_dimension_numbers<[1], [0], [0], [1], [0, 0, 1, 1], [], []>} : vector<16x1024xbf16>, vector<1024x256xbf16>, vector<16x256xf32> -> vector<16x256xf32>
    %c0_3 = arith.constant 0 : index
    %c0_4 = arith.constant 0 : index
    %4 = vector.load %arg3[%c0_3, %c0_4] : memref<1x256xf32, #tpu.memory_space<vmem>>, vector<1x256xf32>
    %5 = vector.broadcast %4 : vector<1x256xf32> to vector<16x256xf32>
    %6 = arith.addf %3, %5 : vector<16x256xf32>
    %cst_5 = arith.constant 0.000000e+00 : f32
    %7 = vector.broadcast %cst_5 : f32 to vector<16x256xf32>
    %8 = arith.maximumf %6, %7 : vector<16x256xf32>
    %9 = arith.truncf %8 : vector<16x256xf32> to vector<16x256xbf16>
    %c0_6 = arith.constant 0 : index
    %c0_7 = arith.constant 0 : index
    %10 = vector.load %arg4[%c0_6, %c0_7] : memref<256x256xbf16, #tpu.memory_space<vmem>>, vector<256x256xbf16>
    %cst_8 = arith.constant dense<0.000000e+00> : vector<16x256xf32>
    %11 = tpu.matmul %9, %10, %cst_8 {dimension_numbers = #tpu.dot_dimension_numbers<[1], [0], [0], [1], [0, 0, 1, 1], [], []>} : vector<16x256xbf16>, vector<256x256xbf16>, vector<16x256xf32> -> vector<16x256xf32>
    %c0_9 = arith.constant 0 : index
    %c0_10 = arith.constant 0 : index
    %12 = vector.load %arg5[%c0_9, %c0_10] : memref<1x256xf32, #tpu.memory_space<vmem>>, vector<1x256xf32>
    %13 = vector.broadcast %12 : vector<1x256xf32> to vector<16x256xf32>
    %14 = arith.addf %11, %13 : vector<16x256xf32>
    %cst_11 = arith.constant 0.000000e+00 : f32
    %15 = vector.broadcast %cst_11 : f32 to vector<16x256xf32>
    %16 = arith.maximumf %14, %15 : vector<16x256xf32>
    %17 = arith.truncf %16 : vector<16x256xf32> to vector<16x256xbf16>
    %c0_12 = arith.constant 0 : index
    %c0_13 = arith.constant 0 : index
    %18 = vector.load %arg6[%c0_12, %c0_13] : memref<256x256xbf16, #tpu.memory_space<vmem>>, vector<256x256xbf16>
    %cst_14 = arith.constant dense<0.000000e+00> : vector<16x256xf32>
    %19 = tpu.matmul %17, %18, %cst_14 {dimension_numbers = #tpu.dot_dimension_numbers<[1], [0], [0], [1], [0, 0, 1, 1], [], []>} : vector<16x256xbf16>, vector<256x256xbf16>, vector<16x256xf32> -> vector<16x256xf32>
    %c0_15 = arith.constant 0 : index
    %c0_16 = arith.constant 0 : index
    %20 = vector.load %arg7[%c0_15, %c0_16] : memref<1x256xf32, #tpu.memory_space<vmem>>, vector<1x256xf32>
    %21 = vector.broadcast %20 : vector<1x256xf32> to vector<16x256xf32>
    %22 = arith.addf %19, %21 : vector<16x256xf32>
    %cst_17 = arith.constant 0.000000e+00 : f32
    %23 = vector.broadcast %cst_17 : f32 to vector<16x256xf32>
    %24 = arith.maximumf %22, %23 : vector<16x256xf32>
    %25 = arith.truncf %24 : vector<16x256xf32> to vector<16x256xbf16>
    %c0_18 = arith.constant 0 : index
    %c0_19 = arith.constant 0 : index
    %26 = vector.load %arg8[%c0_18, %c0_19] : memref<256x128xbf16, #tpu.memory_space<vmem>>, vector<256x128xbf16>
    %cst_20 = arith.constant dense<0.000000e+00> : vector<16x128xf32>
    %27 = tpu.matmul %25, %26, %cst_20 {dimension_numbers = #tpu.dot_dimension_numbers<[1], [0], [0], [1], [0, 0, 1, 1], [], []>} : vector<16x256xbf16>, vector<256x128xbf16>, vector<16x128xf32> -> vector<16x128xf32>
    %c0_21 = arith.constant 0 : index
    %c0_22 = arith.constant 0 : index
    %28 = vector.load %arg9[%c0_21, %c0_22] : memref<1x128xf32, #tpu.memory_space<vmem>>, vector<1x128xf32>
    %29 = vector.broadcast %28 : vector<1x128xf32> to vector<16x128xf32>
    %30 = arith.addf %27, %29 : vector<16x128xf32>
    %c0_23 = arith.constant 0 : index
    %c0_24 = arith.constant 0 : index
    %31 = vector.load %arg10[%c0_23, %c0_24] : memref<16x128xf32, #tpu.memory_space<vmem>>, vector<16x128xf32>
    tpu.vector_store %arg10[%c0_23, %c0_24], %30 {strides = array<i32>} : memref<16x128xf32, #tpu.memory_space<vmem>>, vector<16x128xf32>,
    return
  }
  func.func @transform_0(%arg0: i32) -> (i32, i32) {
    %c0_i32 = arith.constant 0 : i32
    %c0_i32_0 = arith.constant 0 : i32
    return %arg0, %c0_i32 : i32, i32
  }
  func.func @transform_1(%arg0: i32) -> (i32, i32) {
    %c0_i32 = arith.constant 0 : i32
    %c0_i32_0 = arith.constant 0 : i32
    %c0_i32_1 = arith.constant 0 : i32
    return %c0_i32, %c0_i32_0 : i32, i32
  }
  func.func @transform_2(%arg0: i32) -> (i32, i32) {
    %c0_i32 = arith.constant 0 : i32
    %c0_i32_0 = arith.constant 0 : i32
    %c0_i32_1 = arith.constant 0 : i32
    return %c0_i32, %c0_i32_0 : i32, i32
  }
  func.func @transform_3(%arg0: i32) -> (i32, i32) {
    %c0_i32 = arith.constant 0 : i32
    %c0_i32_0 = arith.constant 0 : i32
    %c0_i32_1 = arith.constant 0 : i32
    return %c0_i32, %c0_i32_0 : i32, i32
  }
  func.func @transform_4(%arg0: i32) -> (i32, i32) {
    %c0_i32 = arith.constant 0 : i32
    %c0_i32_0 = arith.constant 0 : i32
    %c0_i32_1 = arith.constant 0 : i32
    return %c0_i32, %c0_i32_0 : i32, i32
  }
  func.func @transform_5(%arg0: i32) -> (i32, i32) {
    %c0_i32 = arith.constant 0 : i32
    %c0_i32_0 = arith.constant 0 : i32
    %c0_i32_1 = arith.constant 0 : i32
    return %c0_i32, %c0_i32_0 : i32, i32
  }
  func.func @transform_6(%arg0: i32) -> (i32, i32) {
    %c0_i32 = arith.constant 0 : i32
    %c0_i32_0 = arith.constant 0 : i32
    %c0_i32_1 = arith.constant 0 : i32
    return %c0_i32, %c0_i32_0 : i32, i32
  }
  func.func @transform_7(%arg0: i32) -> (i32, i32) {
    %c0_i32 = arith.constant 0 : i32
    %c0_i32_0 = arith.constant 0 : i32
    %c0_i32_1 = arith.constant 0 : i32
    return %c0_i32, %c0_i32_0 : i32, i32
  }
  func.func @transform_8(%arg0: i32) -> (i32, i32) {
    %c0_i32 = arith.constant 0 : i32
    %c0_i32_0 = arith.constant 0 : i32
    %c0_i32_1 = arith.constant 0 : i32
    return %c0_i32, %c0_i32_0 : i32, i32
  }
  func.func @transform_9(%arg0: i32) -> (i32, i32) {
    %c0_i32 = arith.constant 0 : i32
    %c0_i32_0 = arith.constant 0 : i32
    return %arg0, %c0_i32 : i32, i32
  }
}

</mosaic_0001>

<bundles_post_ra>
// kernel: mlp_forward.1
= control target key start
LH: loop header
LB: loop body
LE: loop exit
PB: predicated region body
PF: predicated region fallthrough
CT: control target
= control target key end

     0   :  { %14 = vsyncpa [#allocation3], 0  ;;  %s2590_s0 = inlined_call_operand.vmem [shape: f32[16,1024], index: 0, kind: input, shape index: {}]   ;;  %s2591_s1 = inlined_call_operand.hbm [shape: bf16[1024,256], index: 1, kind: input, shape index: {}]   ;;  %s2592_s2 = inlined_call_operand.vmem [shape: f32[1,256], index: 2, kind: input, shape index: {}]   ;;  %s2593_s3 = inlined_call_operand.vmem [shape: bf16[256,256], index: 3, kind: input, shape index: {}]   ;;  %s2594_s4 = inlined_call_operand.vmem [shape: f32[1,256], index: 4, kind: input, shape index: {}]   ;;  %s2595_s5 = inlined_call_operand.hbm [shape: bf16[256,256], index: 5, kind: input, shape index: {}]   ;;  %s2596_s6 = inlined_call_operand.vmem [shape: f32[1,256], index: 6, kind: input, shape index: {}]   ;;  %s2597_s7 = inlined_call_operand.hbm [shape: bf16[256,128], index: 7, kind: input, shape index: {}]   ;;  %s2598_s8 = inlined_call_operand.vmem [shape: f32[1,128], index: 8, kind: input, shape index: {}]   ;;  %s2599_s9 = inlined_call_operand.vmem [shape: f32[16,128], index: 9, kind: output, shape index: {}]  }
   0x1   :  { %15 = vsyncpa [#allocation5], 0  ;;  %s2352_s30 = smov [#allocation4]   ;;  %s2353_s11 = smov [#allocation2]  }
   0x2   :  { %s41_s10 = sshll.u32 %s2352_s30, 4  ;;  %s23_s12 = sshll.u32 %s2353_s11, 4  ;;  %s42_s10 = int_to_ptr.vmem [resolvable:$true] %s41_s10  ;;  %s24_s12 = int_to_ptr.vmem [resolvable:$true] %s23_s12 }
   0x3   :  { %s2296_s13 = scalar_lea.vmem %s42_s10, 4096  ;;  %p2301_p1 = scmp.lt.s32.totalorder %s42_s10, %s42_s10 }
   0x4   :  { %p2297_p0 = scmp.ne.s32.totalorder %s42_s10, %s2296_s13  ;;  %p2302_p2 = scmp.lt.s32.totalorder %s2296_s13, %s2296_s13 }
   0x6   :  { %p2303_p3 = por %p2302_p2, %p2301_p1 }
   0x8   :  { %p2304_p4 = pnand %p2303_p3, %p2297_p0 }
   0xa   :  { %2307 = shalt.err (!%p2304_p4)
}
   0xb   :  { %s2354_s14 = smov 128   ;;  %s2355_s15 = smov 8  }
   0xc   :  { %47 = dma.hbm_to_vmem [thread:$0]  %s2595_s5, 4096, %s42_s10, [#allocation5], %s2354_s14, %s2354_s14, %s2355_s15  }
   0xd   :  { %s2316_s18 = scalar_lea.vmem %s24_s12, 16384  ;;  %p2321_p6 = scmp.lt.s32.totalorder %s24_s12, %s24_s12 }
   0xe   :  { %p2317_p5 = scmp.ne.s32.totalorder %s24_s12, %s2316_s18  ;;  %p2322_p7 = scmp.lt.s32.totalorder %s2316_s18, %s2316_s18 }
  0x10   :  { %p2323_p8 = por %p2322_p7, %p2321_p6 }
  0x12   :  { %p2324_p9 = pnand %p2323_p8, %p2317_p5 }
  0x14   :  { %2327 = shalt.err (!%p2324_p9)
}
  0x15   :  { %29 = dma.hbm_to_vmem [thread:$0]  %s2591_s1, 16384, %s24_s12, [#allocation3], %s2354_s14, %s2354_s14, %s2355_s15  }
  0x16   :  { %s2356_s21 = smov [#allocation6]  }
  0x17   :  { %s55_s22 = sshll.u32 %s2356_s21, 4  ;;  %s56_s22 = int_to_ptr.vmem [resolvable:$true] %s55_s22 }
  0x18   :  { %s2336_s23 = scalar_lea.vmem %s56_s22, 2048  ;;  %p2341_p11 = scmp.lt.s32.totalorder %s56_s22, %s56_s22 }
  0x19   :  { %p2337_p10 = scmp.ne.s32.totalorder %s56_s22, %s2336_s23  ;;  %p2342_p12 = scmp.lt.s32.totalorder %s2336_s23, %s2336_s23 }
  0x1b   :  { %p2343_p13 = por %p2342_p12, %p2341_p11 }
  0x1d   :  { %p2344_p0 = pnand %p2343_p13, %p2337_p10 }
  0x1f   :  { %2347 = shalt.err (!%p2344_p0)
}
  0x20   :  { %s2357_s5 = smov 64   ;;  %s2358_s24 = smov 4  }
  0x21   :  { %61 = dma.hbm_to_vmem [thread:$0]  %s2597_s7, 2048, %s56_s22, [#allocation5], %s2357_s5, %s2357_s5, %s2358_s24  }
  0x22   :  { %2348 = dma.done.wait [#allocation3], 16384  }
  0x23   :  { %2349 = vsyncadd [#allocation3], 4294950912 }
  0x24   :  { %2350 = dma.done.wait [#allocation5], 6144  }
  0x25   :  { %2351 = vsyncadd [#allocation5], 4294961152  ;;  %v1984_v0 = vld [vmem:[#allocation2 + $0x74] ss:$8 sps:$4 sm:$0xff]   ;;  %v1988_v2 = vld [vmem:[#allocation2 + $0x70] ss:$8 sps:$4 sm:$0xff]  }
  0x26   :  { %v1986_v1 = vld [vmem:[#allocation2 + $0x174] ss:$8 sps:$4 sm:$0xff]   ;;  %878 = vmatprep.subr.bf16.mxu0 %v1984_v0  ;;  %v1989_v3 = vld [vmem:[#allocation2 + $0x170] ss:$8 sps:$4 sm:$0xff]   ;;  %v1990_v4 = vld [vmem:[#allocation2 + $0x64] ss:$8 sps:$4 sm:$0xff]  }
  0x27   :  { %921 = vmatprep.subr.bf16.mxu1 %v1986_v1  ;;  %879 = vmatpush1.bf16.msra.mxu0 %v1988_v2  ;;  %v1992_v5 = vld [vmem:[#allocation2 + $0x164] ss:$8 sps:$4 sm:$0xff]   ;;  %v1994_v6 = vld [vmem:[#allocation2 + $0x60] ss:$8 sps:$4 sm:$0xff]   ;;  %v1996_v8 = vld [vmem:[#allocation2 + $0x54] ss:$8 sps:$4 sm:$0xff]  }
  0x28   :  { %922 = vmatpush1.bf16.msra.mxu1 %v1989_v3  ;;  %880 = vmatprep.subr.bf16.mxu0 %v1990_v4  ;;  %v1995_v7 = vld [vmem:[#allocation2 + $0x160] ss:$8 sps:$4 sm:$0xff]   ;;  %v1998_v9 = vld [vmem:[#allocation2 + $0x154] ss:$8 sps:$4 sm:$0xff]   ;;  %v2000_v10 = vld [vmem:[#allocation2 + $0x50] ss:$8 sps:$4 sm:$0xff]  }
  0x29   :  { %923 = vmatprep.subr.bf16.mxu1 %v1992_v5  ;;  %v2001_v11 = vld [vmem:[#allocation2 + $0x150] ss:$8 sps:$4 sm:$0xff]   ;;  %v2002_v12 = vld [vmem:[#allocation2 + $0x44] ss:$8 sps:$4 sm:$0xff]   ;;  %v2006_v14 = vld [vmem:[#allocation2 + $0x40] ss:$8 sps:$4 sm:$0xff]  }
  0x2a   :  { %v2004_v13 = vld [vmem:[#allocation2 + $0x144] ss:$8 sps:$4 sm:$0xff]   ;;  %v2007_v15 = vld [vmem:[#allocation2 + $0x140] ss:$8 sps:$4 sm:$0xff]   ;;  %v2008_v16 = vld [vmem:[#allocation2 + $0x34] ss:$8 sps:$4 sm:$0xff]  }
  0x2b   :  { %881 = vmatpush1.bf16.msra.mxu0 %v1994_v6  ;;  %v2010_v17 = vld [vmem:[#allocation2 + $0x134] ss:$8 sps:$4 sm:$0xff]   ;;  %v2012_v18 = vld [vmem:[#allocation2 + $0x30] ss:$8 sps:$4 sm:$0xff]   ;;  %v2014_v20 = vld [vmem:[#allocation2 + $0x24] ss:$8 sps:$4 sm:$0xff]  }
  0x2c   :  { %924 = vmatpush1.bf16.msra.mxu1 %v1995_v7  ;;  %882 = vmatprep.subr.bf16.mxu0 %v1996_v8  ;;  %v2013_v19 = vld [vmem:[#allocation2 + $0x130] ss:$8 sps:$4 sm:$0xff]   ;;  %v2016_v21 = vld [vmem:[#allocation2 + $0x124] ss:$8 sps:$4 sm:$0xff]   ;;  %v2018_v22 = vld [vmem:[#allocation2 + $0x20] ss:$8 sps:$4 sm:$0xff]  }
  0x2d   :  { %925 = vmatprep.subr.bf16.mxu1 %v1998_v9  ;;  %v2019_v23 = vld [vmem:[#allocation2 + $0x120] ss:$8 sps:$4 sm:$0xff]   ;;  %v2020_v24 = vld [vmem:[#allocation2 + $0x14] ss:$8 sps:$4 sm:$0xff]   ;;  %v2024_v26 = vld [vmem:[#allocation2 + $0x10] ss:$8 sps:$4 sm:$0xff]  }
  0x2e   :  { %v2022_v25 = vld [vmem:[#allocation2 + $0x114] ss:$8 sps:$4 sm:$0xff]   ;;  %v2025_v27 = vld [vmem:[#allocation2 + $0x110] ss:$8 sps:$4 sm:$0xff]   ;;  %v2026_v28 = vld [vmem:[#allocation2 + $0x4] ss:$8 sps:$4 sm:$0xff]  }
  0x2f   :  { %883 = vmatpush1.bf16.msra.mxu0 %v2000_v10  ;;  %v2028_v29 = vld [vmem:[#allocation2 + $0x104] ss:$8 sps:$4 sm:$0xff]   ;;  %v2030_v30 = vld [vmem:[#allocation2] ss:$8 sps:$4 sm:$0xff]   ;;  %v2032_v32 = vld [vmem:[#allocation2 + $0xf4] ss:$8 sps:$4 sm:$0xff]  }
  0x30   :  { %926 = vmatpush1.bf16.msra.mxu1 %v2001_v11  ;;  %884 = vmatprep.subr.bf16.mxu0 %v2002_v12  ;;  %v2031_v31 = vld [vmem:[#allocation2 + $0x100] ss:$8 sps:$4 sm:$0xff]   ;;  %v2034_v33 = vld [vmem:[#allocation2 + $0x1f4] ss:$8 sps:$4 sm:$0xff]   ;;  %v2036_v34 = vld [vmem:[#allocation2 + $0xf0] ss:$8 sps:$4 sm:$0xff]  }
  0x31   :  { %927 = vmatprep.subr.bf16.mxu1 %v2004_v13  ;;  %v2037_v35 = vld [vmem:[#allocation2 + $0x1f0] ss:$8 sps:$4 sm:$0xff]   ;;  %v2038_v36 = vld [vmem:[#allocation2 + $0xe4] ss:$8 sps:$4 sm:$0xff]   ;;  %v2042_v38 = vld [vmem:[#allocation2 + $0xe0] ss:$8 sps:$4 sm:$0xff]  }
  0x32   :  { %v2040_v37 = vld [vmem:[#allocation2 + $0x1e4] ss:$8 sps:$4 sm:$0xff]   ;;  %v2043_v39 = vld [vmem:[#allocation2 + $0x1e0] ss:$8 sps:$4 sm:$0xff]   ;;  %v2044_v40 = vld [vmem:[#allocation2 + $0xd4] ss:$8 sps:$4 sm:$0xff]  }
  0x33   :  { %885 = vmatpush1.bf16.msra.mxu0 %v2006_v14  ;;  %v2046_v41 = vld [vmem:[#allocation2 + $0x1d4] ss:$8 sps:$4 sm:$0xff]   ;;  %v2048_v42 = vld [vmem:[#allocation2 + $0xd0] ss:$8 sps:$4 sm:$0xff]   ;;  %v2050_v44 = vld [vmem:[#allocation2 + $0xc4] ss:$8 sps:$4 sm:$0xff]  }
  0x34   :  { %928 = vmatpush1.bf16.msra.mxu1 %v2007_v15  ;;  %886 = vmatprep.subr.bf16.mxu0 %v2008_v16  ;;  %v2049_v43 = vld [vmem:[#allocation2 + $0x1d0] ss:$8 sps:$4 sm:$0xff]   ;;  %v2052_v45 = vld [vmem:[#allocation2 + $0x1c4] ss:$8 sps:$4 sm:$0xff]   ;;  %v2054_v50 = vld [vmem:[#allocation2 + $0xc0] ss:$8 sps:$4 sm:$0xff]  }
  0x35   :  { %929 = vmatprep.subr.bf16.mxu1 %v2010_v17  ;;  %v75_v46 = vld [vmem:[%s2590_s0 + $0x8] sm:$0xff]  ;;  %v77_v48 = vld [vmem:[%s2590_s0 + $0x18] sm:$0xff]  ;;  %v74_v6 = vld [vmem:[%s2590_s0] sm:$0xff] }
  0x36   :  { %v83_v47 = vld [vmem:[%s2590_s0 + $0x48] sm:$0xff]  ;;  %v85_v49 = vld [vmem:[%s2590_s0 + $0x58] sm:$0xff]  ;;  %v82_v7 = vld [vmem:[%s2590_s0 + $0x40] sm:$0xff] }
  0x37   :  { %887 = vmatpush1.bf16.msra.mxu0 %v2012_v18  ;;  %v2055_v51 = vld [vmem:[#allocation2 + $0x1c0] ss:$8 sps:$4 sm:$0xff]   ;;  %v2056_v52 = vld [vmem:[#allocation2 + $0xb4] ss:$8 sps:$4 sm:$0xff]   ;;  %v91_v53 = vpack.c.bf16 %v83_v47, %v75_v46  ;;  %v93_v54 = vpack.c.bf16 %v85_v49, %v77_v48  ;;  %v2060_v56 = vld [vmem:[#allocation2 + $0xb0] ss:$8 sps:$4 sm:$0xff]   ;;  %v90_v12 = vpack.c.bf16 %v82_v7, %v74_v6 }
  0x38   :  { %930 = vmatpush1.bf16.msra.mxu1 %v2013_v19  ;;  %888 = vmatprep.subr.bf16.mxu0 %v2014_v20  ;;  %v2058_v55 = vld [vmem:[#allocation2 + $0x1b4] ss:$8 sps:$4 sm:$0xff]   ;;  %v2061_v57 = vld [vmem:[#allocation2 + $0x1b0] ss:$8 sps:$4 sm:$0xff]   ;;  %v2062_v58 = vld [vmem:[#allocation2 + $0xa4] ss:$8 sps:$4 sm:$0xff]  }
  0x39   :  { %931 = vmatprep.subr.bf16.mxu1 %v2016_v21  ;;  %910 = vmatprep.mubr.bf16.mxu0 %v91_v53  ;;  %v2064_v59 = vld [vmem:[#allocation2 + $0x1a4] ss:$8 sps:$4 sm:$0xff]   ;;  %v2066_v60 = vld [vmem:[#allocation2 + $0xa0] ss:$8 sps:$4 sm:$0xff]   ;;  %v2068_v62 = vld [vmem:[#allocation2 + $0x94] ss:$8 sps:$4 sm:$0xff]  }
  0x3a   :  { %953 = vmatprep.mubr.bf16.mxu1 %v93_v54  ;;  %v2067_v61 = vld [vmem:[#allocation2 + $0x1a0] ss:$8 sps:$4 sm:$0xff]   ;;  %v2070_v63 = vld [vmem:[#allocation2 + $0x194] ss:$8 sps:$4 sm:$0xff]   ;;  %v2072_v0 = vld [vmem:[#allocation2 + $0x90] ss:$8 sps:$4 sm:$0xff]  }
  0x3b   :  { %889 = vmatpush1.bf16.msra.mxu0 %v2018_v22  ;;  %v2073_v1 = vld [vmem:[#allocation2 + $0x190] ss:$8 sps:$4 sm:$0xff]   ;;  %v2074_v2 = vld [vmem:[#allocation2 + $0x84] ss:$8 sps:$4 sm:$0xff]   ;;  %v2078_v4 = vld [vmem:[#allocation2 + $0x80] ss:$8 sps:$4 sm:$0xff]  }
  0x3c   :  { %932 = vmatpush1.bf16.msra.mxu1 %v2019_v23  ;;  %890 = vmatprep.subr.bf16.mxu0 %v2020_v24  ;;  %v2076_v3 = vld [vmem:[#allocation2 + $0x184] ss:$8 sps:$4 sm:$0xff]   ;;  %v2079_v5 = vld [vmem:[#allocation2 + $0x180] ss:$8 sps:$4 sm:$0xff]   ;;  %v76_v8 = vld [vmem:[%s2590_s0 + $0x10] sm:$0xff] }
  0x3d   :  { %933 = vmatprep.subr.bf16.mxu1 %v2022_v25  ;;  %v84_v9 = vld [vmem:[%s2590_s0 + $0x50] sm:$0xff]  ;;  %v2088_v16 = vld [vmem:[#allocation2 + $0x264] ss:$8 sps:$4 sm:$0xff]   ;;  %v2086_v18 = vld [vmem:[#allocation2 + $0x260] ss:$8 sps:$4 sm:$0xff]  }
  0x3e   :  { %v2082_v10 = vld [vmem:[#allocation2 + $0x274] ss:$8 sps:$4 sm:$0xff]   ;;  %v92_v13 = vpack.c.bf16 %v84_v9, %v76_v8  ;;  %v2080_v14 = vld [vmem:[#allocation2 + $0x270] ss:$8 sps:$4 sm:$0xff]   ;;  %v2091_v17 = vld [vmem:[#allocation2 + $0x364] ss:$8 sps:$4 sm:$0xff]  }
  0x3f   :  { %891 = vmatpush1.bf16.msra.mxu0 %v2024_v26  ;;  %v2085_v11 = vld [vmem:[#allocation2 + $0x374] ss:$8 sps:$4 sm:$0xff]   ;;  %v2083_v15 = vld [vmem:[#allocation2 + $0x370] ss:$8 sps:$4 sm:$0xff]   ;;  %v2089_v19 = vld [vmem:[#allocation2 + $0x360] ss:$8 sps:$4 sm:$0xff]  }
  0x40   :  { %934 = vmatpush1.bf16.msra.mxu1 %v2025_v27  ;;  %892 = vmatprep.subr.bf16.mxu0 %v2026_v28  ;;  %v2094_v20 = vld [vmem:[#allocation2 + $0x254] ss:$8 sps:$4 sm:$0xff]   ;;  %v2092_v22 = vld [vmem:[#allocation2 + $0x250] ss:$8 sps:$4 sm:$0xff]   ;;  %v2100_v24 = vld [vmem:[#allocation2 + $0x244] ss:$8 sps:$4 sm:$0xff]  }
  0x41   :  { %935 = vmatprep.subr.bf16.mxu1 %v2028_v29  ;;  %v2097_v21 = vld [vmem:[#allocation2 + $0x354] ss:$8 sps:$4 sm:$0xff]   ;;  %v2095_v23 = vld [vmem:[#allocation2 + $0x350] ss:$8 sps:$4 sm:$0xff]   ;;  %v2103_v25 = vld [vmem:[#allocation2 + $0x344] ss:$8 sps:$4 sm:$0xff]  }
  0x42   :  { %v2098_v26 = vld [vmem:[#allocation2 + $0x240] ss:$8 sps:$4 sm:$0xff]   ;;  %v2106_v28 = vld [vmem:[#allocation2 + $0x234] ss:$8 sps:$4 sm:$0xff]   ;;  %v2131_v53 = vld [vmem:[#allocation2 + $0x3f0] ss:$8 sps:$4 sm:$0xff]  }
  0x43   :  { %893 = vmatpush1.bf16.msra.mxu0 %v2030_v30  ;;  %v2101_v27 = vld [vmem:[#allocation2 + $0x340] ss:$8 sps:$4 sm:$0xff]   ;;  %v2109_v29 = vld [vmem:[#allocation2 + $0x334] ss:$8 sps:$4 sm:$0xff]   ;;  %v2104_v30 = vld [vmem:[#allocation2 + $0x230] ss:$8 sps:$4 sm:$0xff]  }
  0x44   :  { %936 = vmatpush1.bf16.msra.mxu1 %v2031_v31  ;;  %894 = vmatprep.subr.bf16.mxu0 %v2032_v32  ;;  %v2107_v31 = vld [vmem:[#allocation2 + $0x330] ss:$8 sps:$4 sm:$0xff]   ;;  %v2112_v32 = vld [vmem:[#allocation2 + $0x224] ss:$8 sps:$4 sm:$0xff]   ;;  %v2122_v47 = vld [vmem:[#allocation2 + $0x200] ss:$8 sps:$4 sm:$0xff]  }
  0x45   :  { %937 = vmatprep.subr.bf16.mxu1 %v2034_v33  ;;  %v2115_v33 = vld [vmem:[#allocation2 + $0x324] ss:$8 sps:$4 sm:$0xff]   ;;  %v89_v46 = vld [vmem:[%s2590_s0 + $0x78] sm:$0xff]  ;;  %v2125_v48 = vld [vmem:[#allocation2 + $0x300] ss:$8 sps:$4 sm:$0xff]  }
  0x46   :  { %v2136_v54 = vld [vmem:[#allocation2 + $0x2e4] ss:$8 sps:$4 sm:$0xff]   ;;  %v2158_v8 = vld [vmem:[#allocation2 + $0x2a0] ss:$8 sps:$4 sm:$0xff]  }
  0x47   :  { %895 = vmatpush2.bf16.msra.mxu0 %v2036_v34  ;;  %v2110_v34 = vld [vmem:[#allocation2 + $0x220] ss:$8 sps:$4 sm:$0xff]   ;;  %v2160_v6 = vld [vmem:[#allocation2 + $0x2a4] ss:$8 sps:$4 sm:$0xff]  }
  0x48   :  { %938 = vmatpush2.bf16.msra.mxu1 %v2037_v35  ;;  %896 = vmatprep.subr.bf16.mxu0 %v2038_v36  ;;  %v2113_v35 = vld [vmem:[#allocation2 + $0x320] ss:$8 sps:$4 sm:$0xff]   ;;  %v2118_v36 = vld [vmem:[#allocation2 + $0x214] ss:$8 sps:$4 sm:$0xff]   ;;  %v2163_v7 = vld [vmem:[#allocation2 + $0x3a4] ss:$8 sps:$4 sm:$0xff]  }
  0x49   :  { %939 = vmatprep.subr.bf16.mxu1 %v2040_v37  ;;  %v2121_v37 = vld [vmem:[#allocation2 + $0x314] ss:$8 sps:$4 sm:$0xff]   ;;  %v2161_v9 = vld [vmem:[#allocation2 + $0x3a0] ss:$8 sps:$4 sm:$0xff]  }
  0x4b   :  { %897 = vmatpush2.bf16.msra.mxu0 %v2042_v38  ;;  %v2116_v38 = vld [vmem:[#allocation2 + $0x210] ss:$8 sps:$4 sm:$0xff]  }
  0x4c   :  { %940 = vmatpush2.bf16.msra.mxu1 %v2043_v39  ;;  %898 = vmatprep.subr.bf16.mxu0 %v2044_v40  ;;  %v2119_v39 = vld [vmem:[#allocation2 + $0x310] ss:$8 sps:$4 sm:$0xff]   ;;  %v79_v40 = vld [vmem:[%s2590_s0 + $0x28] sm:$0xff] }
  0x4d   :  { %941 = vmatprep.subr.bf16.mxu1 %v2046_v41  ;;  %v87_v41 = vld [vmem:[%s2590_s0 + $0x68] sm:$0xff] }
  0x4f   :  { %899 = vmatpush2.bf16.msra.mxu0 %v2048_v42  ;;  %v81_v42 = vld [vmem:[%s2590_s0 + $0x38] sm:$0xff] }
  0x50   :  { %942 = vmatpush2.bf16.msra.mxu1 %v2049_v43  ;;  %900 = vmatprep.subr.bf16.mxu0 %v2050_v44  ;;  %v2124_v43 = vld [vmem:[#allocation2 + $0x204] ss:$8 sps:$4 sm:$0xff]   ;;  %v97_v49 = vpack.c.bf16 %v89_v46, %v81_v42 }
  0x51   :  { %943 = vmatprep.subr.bf16.mxu1 %v2052_v45  ;;  %v2127_v44 = vld [vmem:[#allocation2 + $0x304] ss:$8 sps:$4 sm:$0xff]   ;;  %v95_v45 = vpack.c.bf16 %v87_v41, %v79_v40  ;;  %v2202_v40 = vld [vmem:[%s2593_s3 + $0xf4] ss:$8 sps:$4 sm:$0xff]   ;;  %v2200_v41 = vld [vmem:[%s2593_s3 + $0xf0] ss:$8 sps:$4 sm:$0xff]  }
  0x52   :  { %v2205_v42 = vld [vmem:[%s2593_s3 + $0xe4] ss:$8 sps:$4 sm:$0xff]  }
  0x53   :  { %901 = vmatpush2.bf16.msra.mxu0 %v2054_v50  ;;  %v2130_v50 = vld [vmem:[#allocation2 + $0x2f4] ss:$8 sps:$4 sm:$0xff]   ;;  %v2211_v46 = vld [vmem:[%s2593_s3 + $0xc4] ss:$8 sps:$4 sm:$0xff]  }
  0x54   :  { %944 = vmatpush2.bf16.msra.mxu1 %v2055_v51  ;;  %902 = vmatprep.subr.bf16.mxu0 %v2056_v52  ;;  %v2133_v51 = vld [vmem:[#allocation2 + $0x3f4] ss:$8 sps:$4 sm:$0xff]   ;;  %v2128_v52 = vld [vmem:[#allocation2 + $0x2f0] ss:$8 sps:$4 sm:$0xff]  }
  0x55   :  { %945 = vmatprep.subr.bf16.mxu1 %v2058_v55  ;;  %v2139_v55 = vld [vmem:[#allocation2 + $0x3e4] ss:$8 sps:$4 sm:$0xff]  }
  0x57   :  { %903 = vmatpush2.bf16.msra.mxu0 %v2060_v56  ;;  %v2134_v56 = vld [vmem:[#allocation2 + $0x2e0] ss:$8 sps:$4 sm:$0xff]  }
  0x58   :  { %946 = vmatpush2.bf16.msra.mxu1 %v2061_v57  ;;  %904 = vmatprep.subr.bf16.mxu0 %v2062_v58  ;;  %v2137_v57 = vld [vmem:[#allocation2 + $0x3e0] ss:$8 sps:$4 sm:$0xff]   ;;  %v2142_v58 = vld [vmem:[#allocation2 + $0x2d4] ss:$8 sps:$4 sm:$0xff]  }
  0x59   :  { %947 = vmatprep.subr.bf16.mxu1 %v2064_v59  ;;  %v2145_v59 = vld [vmem:[#allocation2 + $0x3d4] ss:$8 sps:$4 sm:$0xff]  }
  0x5b   :  { %905 = vmatpush2.bf16.msra.mxu0 %v2066_v60  ;;  %v2140_v60 = vld [vmem:[#allocation2 + $0x2d0] ss:$8 sps:$4 sm:$0xff]  }
  0x5c   :  { %948 = vmatpush2.bf16.msra.mxu1 %v2067_v61  ;;  %906 = vmatprep.subr.bf16.mxu0 %v2068_v62  ;;  %v2143_v61 = vld [vmem:[#allocation2 + $0x3d0] ss:$8 sps:$4 sm:$0xff]   ;;  %v2148_v62 = vld [vmem:[#allocation2 + $0x2c4] ss:$8 sps:$4 sm:$0xff]  }
  0x5d   :  { %949 = vmatprep.subr.bf16.mxu1 %v2070_v63  ;;  %v2151_v63 = vld [vmem:[#allocation2 + $0x3c4] ss:$8 sps:$4 sm:$0xff]  }
  0x5f   :  { %907 = vmatpush2.bf16.msra.mxu0 %v2072_v0  ;;  %v2146_v0 = vld [vmem:[#allocation2 + $0x2c0] ss:$8 sps:$4 sm:$0xff]  }
  0x60   :  { %950 = vmatpush2.bf16.msra.mxu1 %v2073_v1  ;;  %908 = vmatprep.subr.bf16.mxu0 %v2074_v2  ;;  %v2149_v1 = vld [vmem:[#allocation2 + $0x3c0] ss:$8 sps:$4 sm:$0xff]   ;;  %v2154_v2 = vld [vmem:[#allocation2 + $0x2b4] ss:$8 sps:$4 sm:$0xff]  }
  0x61   :  { %951 = vmatprep.subr.bf16.mxu1 %v2076_v3  ;;  %v2157_v3 = vld [vmem:[#allocation2 + $0x3b4] ss:$8 sps:$4 sm:$0xff]  }
  0x63   :  { %909 = vmatpush2.bf16.msra.mxu0 %v2078_v4  ;;  %v2152_v4 = vld [vmem:[#allocation2 + $0x2b0] ss:$8 sps:$4 sm:$0xff]  }
  0x64   :  { %952 = vmatpush2.bf16.msra.mxu1 %v2079_v5  ;;  %964 = vmatprep.subr.bf16.mxu0 %v2082_v10  ;;  %v2155_v5 = vld [vmem:[#allocation2 + $0x3b0] ss:$8 sps:$4 sm:$0xff]   ;;  %v2166_v10 = vld [vmem:[#allocation2 + $0x294] ss:$8 sps:$4 sm:$0xff]  }
  0x65   :  { %1007 = vmatprep.subr.bf16.mxu1 %v2085_v11  ;;  %v2169_v11 = vld [vmem:[#allocation2 + $0x394] ss:$8 sps:$4 sm:$0xff]  }
  0x66   :  { %911 = vmatmul.mubr.bf16.vlgmr.msra.gmra.mxu0 %v90_v12  ;;  %v2164_v12 = vld [vmem:[#allocation2 + $0x290] ss:$8 sps:$4 sm:$0xff]  }
  0x67   :  { %954 = vmatmul.mubr.bf16.vlgmr.msra.gmra.mxu1 %v92_v13  ;;  %965 = vmatpush1.bf16.msra.mxu0 %v2080_v14  ;;  %v2167_v13 = vld [vmem:[#allocation2 + $0x390] ss:$8 sps:$4 sm:$0xff]   ;;  %v2172_v14 = vld [vmem:[#allocation2 + $0x284] ss:$8 sps:$4 sm:$0xff]  }
  0x68   :  { %1008 = vmatpush1.bf16.msra.mxu1 %v2083_v15  ;;  %966 = vmatprep.subr.bf16.mxu0 %v2088_v16  ;;  %v2175_v15 = vld [vmem:[#allocation2 + $0x384] ss:$8 sps:$4 sm:$0xff]   ;;  %v2170_v16 = vld [vmem:[#allocation2 + $0x280] ss:$8 sps:$4 sm:$0xff]  }
  0x69   :  { %1009 = vmatprep.subr.bf16.mxu1 %v2091_v17  ;;  %996 = vmatprep.mubr.bf16.mxu0 %v95_v45  ;;  %v2173_v17 = vld [vmem:[#allocation2 + $0x380] ss:$8 sps:$4 sm:$0xff]   ;;  %v2206_v45 = vld [vmem:[%s2593_s3 + $0xd0] ss:$8 sps:$4 sm:$0xff]  }
  0x6a   :  { %1039 = vmatprep.mubr.bf16.mxu1 %v97_v49  ;;  %v2212_v49 = vld [vmem:[%s2593_s3 + $0xb0] ss:$8 sps:$4 sm:$0xff]  }
  0x6b   :  { %967 = vmatpush1.bf16.msra.mxu0 %v2086_v18  ;;  %v78_v18 = vld [vmem:[%s2590_s0 + $0x20] sm:$0xff] }
  0x6c   :  { %1010 = vmatpush1.bf16.msra.mxu1 %v2089_v19  ;;  %968 = vmatprep.subr.bf16.mxu0 %v2094_v20  ;;  %v86_v19 = vld [vmem:[%s2590_s0 + $0x60] sm:$0xff]  ;;  %v80_v20 = vld [vmem:[%s2590_s0 + $0x30] sm:$0xff] }
  0x6d   :  { %1011 = vmatprep.subr.bf16.mxu1 %v2097_v21  ;;  %v88_v21 = vld [vmem:[%s2590_s0 + $0x70] sm:$0xff] }
  0x6f   :  { %969 = vmatpush1.bf16.msra.mxu0 %v2092_v22  ;;  %v94_v22 = vpack.c.bf16 %v86_v19, %v78_v18  ;;  %v228_v18 = vlaneseq }
  0x70   :  { %1012 = vmatpush1.bf16.msra.mxu1 %v2095_v23  ;;  %970 = vmatprep.subr.bf16.mxu0 %v2100_v24  ;;  %v96_v23 = vpack.c.bf16 %v88_v21, %v80_v20  ;;  %v2176_v24 = vld [vmem:[%s2593_s3 + $0x70] ss:$8 sps:$4 sm:$0xff]  }
  0x71   :  { %1013 = vmatprep.subr.bf16.mxu1 %v2103_v25  ;;  %v2178_v25 = vld [vmem:[%s2593_s3 + $0x74] ss:$8 sps:$4 sm:$0xff]   ;;  %v229_v19 = vshrl.u32 %v228_v18, 7 }
  0x73   :  { %971 = vmatpush1.bf16.msra.mxu0 %v2098_v26  ;;  %v2181_v26 = vld [vmem:[%s2593_s3 + $0x64] ss:$8 sps:$4 sm:$0xff]  }
  0x74   :  { %1014 = vmatpush1.bf16.msra.mxu1 %v2101_v27  ;;  %972 = vmatprep.subr.bf16.mxu0 %v2106_v28  ;;  %v2179_v27 = vld [vmem:[%s2593_s3 + $0x60] ss:$8 sps:$4 sm:$0xff]   ;;  %v2184_v28 = vld [vmem:[%s2593_s3 + $0x54] ss:$8 sps:$4 sm:$0xff]  }
  0x75   :  { %1015 = vmatprep.subr.bf16.mxu1 %v2109_v29  ;;  %v2182_v29 = vld [vmem:[%s2593_s3 + $0x50] ss:$8 sps:$4 sm:$0xff]  }
  0x77   :  { %973 = vmatpush1.bf16.msra.mxu0 %v2104_v30  ;;  %v2187_v30 = vld [vmem:[%s2593_s3 + $0x44] ss:$8 sps:$4 sm:$0xff]  }
  0x78   :  { %1016 = vmatpush1.bf16.msra.mxu1 %v2107_v31  ;;  %974 = vmatprep.subr.bf16.mxu0 %v2112_v32  ;;  %v2185_v31 = vld [vmem:[%s2593_s3 + $0x40] ss:$8 sps:$4 sm:$0xff]   ;;  %v2190_v32 = vld [vmem:[%s2593_s3 + $0x34] ss:$8 sps:$4 sm:$0xff]  }
  0x79   :  { %1017 = vmatprep.subr.bf16.mxu1 %v2115_v33  ;;  %v2188_v33 = vld [vmem:[%s2593_s3 + $0x30] ss:$8 sps:$4 sm:$0xff]  }
  0x7b   :  { %975 = vmatpush1.bf16.msra.mxu0 %v2110_v34  ;;  %v2193_v34 = vld [vmem:[%s2593_s3 + $0x24] ss:$8 sps:$4 sm:$0xff]  }
  0x7c   :  { %1018 = vmatpush1.bf16.msra.mxu1 %v2113_v35  ;;  %976 = vmatprep.subr.bf16.mxu0 %v2118_v36  ;;  %v2191_v35 = vld [vmem:[%s2593_s3 + $0x20] ss:$8 sps:$4 sm:$0xff]   ;;  %v2196_v36 = vld [vmem:[%s2593_s3 + $0x14] ss:$8 sps:$4 sm:$0xff]  }
  0x7d   :  { %1019 = vmatprep.subr.bf16.mxu1 %v2121_v37  ;;  %v2194_v37 = vld [vmem:[%s2593_s3 + $0x10] ss:$8 sps:$4 sm:$0xff]  }
  0x7f   :  { %977 = vmatpush1.bf16.msra.mxu0 %v2116_v38  ;;  %v2199_v38 = vld [vmem:[%s2593_s3 + $0x4] ss:$8 sps:$4 sm:$0xff]  }
  0x80   :  { %1020 = vmatpush1.bf16.msra.mxu1 %v2119_v39  ;;  %978 = vmatprep.subr.bf16.mxu0 %v2124_v43  ;;  %v2197_v39 = vld [vmem:[%s2593_s3] ss:$8 sps:$4 sm:$0xff]  }
  0x81   :  { %1021 = vmatprep.subr.bf16.mxu1 %v2127_v44  ;;  %v2203_v43 = vld [vmem:[%s2593_s3 + $0xe0] ss:$8 sps:$4 sm:$0xff]   ;;  %v2208_v44 = vld [vmem:[%s2593_s3 + $0xd4] ss:$8 sps:$4 sm:$0xff]  }
  0x83   :  { %979 = vmatpush1.bf16.msra.mxu0 %v2122_v47  ;;  %v2209_v47 = vld [vmem:[%s2593_s3 + $0xc0] ss:$8 sps:$4 sm:$0xff]  }
  0x84   :  { %1022 = vmatpush1.bf16.msra.mxu1 %v2125_v48  ;;  %980 = vmatprep.subr.bf16.mxu0 %v2130_v50  ;;  %v2214_v48 = vld [vmem:[%s2593_s3 + $0xb4] ss:$8 sps:$4 sm:$0xff]   ;;  %v2217_v50 = vld [vmem:[%s2593_s3 + $0xa4] ss:$8 sps:$4 sm:$0xff]  }
  0x85   :  { %1023 = vmatprep.subr.bf16.mxu1 %v2133_v51  ;;  %v2215_v51 = vld [vmem:[%s2593_s3 + $0xa0] ss:$8 sps:$4 sm:$0xff]  }
  0x87   :  { %981 = vmatpush2.bf16.msra.mxu0 %v2128_v52  ;;  %v2220_v52 = vld [vmem:[%s2593_s3 + $0x94] ss:$8 sps:$4 sm:$0xff]  }
  0x88   :  { %1024 = vmatpush2.bf16.msra.mxu1 %v2131_v53  ;;  %982 = vmatprep.subr.bf16.mxu0 %v2136_v54  ;;  %v2218_v53 = vld [vmem:[%s2593_s3 + $0x90] ss:$8 sps:$4 sm:$0xff]   ;;  %v2223_v54 = vld [vmem:[%s2593_s3 + $0x84] ss:$8 sps:$4 sm:$0xff]  }
  0x89   :  { %1025 = vmatprep.subr.bf16.mxu1 %v2139_v55  ;;  %v2221_v55 = vld [vmem:[%s2593_s3 + $0x80] ss:$8 sps:$4 sm:$0xff]  }
  0x8b   :  { %983 = vmatpush2.bf16.msra.mxu0 %v2134_v56  ;;  %v2224_v56 = vld [vmem:[#allocation4 + $0x70] ss:$8 sps:$4 sm:$0xff]  }
  0x8c   :  { %1026 = vmatpush2.bf16.msra.mxu1 %v2137_v57  ;;  %984 = vmatprep.subr.bf16.mxu0 %v2142_v58  ;;  %v2226_v57 = vld [vmem:[#allocation4 + $0x74] ss:$8 sps:$4 sm:$0xff]   ;;  %v2229_v58 = vld [vmem:[#allocation4 + $0x64] ss:$8 sps:$4 sm:$0xff]  }
  0x8d   :  { %1027 = vmatprep.subr.bf16.mxu1 %v2145_v59  ;;  %v2227_v59 = vld [vmem:[#allocation4 + $0x60] ss:$8 sps:$4 sm:$0xff]  }
  0x8f   :  { %985 = vmatpush2.bf16.msra.mxu0 %v2140_v60  ;;  %v2232_v60 = vld [vmem:[#allocation4 + $0x54] ss:$8 sps:$4 sm:$0xff]  }
  0x90   :  { %1028 = vmatpush2.bf16.msra.mxu1 %v2143_v61  ;;  %986 = vmatprep.subr.bf16.mxu0 %v2148_v62  ;;  %v2230_v61 = vld [vmem:[#allocation4 + $0x50] ss:$8 sps:$4 sm:$0xff]   ;;  %v2235_v62 = vld [vmem:[#allocation4 + $0x44] ss:$8 sps:$4 sm:$0xff]  }
  0x91   :  { %1029 = vmatprep.subr.bf16.mxu1 %v2151_v63  ;;  %v2233_v63 = vld [vmem:[#allocation4 + $0x40] ss:$8 sps:$4 sm:$0xff]  }
  0x93   :  { %987 = vmatpush2.bf16.msra.mxu0 %v2146_v0  ;;  %v2238_v0 = vld [vmem:[#allocation4 + $0x34] ss:$8 sps:$4 sm:$0xff]  }
  0x94   :  { %1030 = vmatpush2.bf16.msra.mxu1 %v2149_v1  ;;  %988 = vmatprep.subr.bf16.mxu0 %v2154_v2  ;;  %v2236_v1 = vld [vmem:[#allocation4 + $0x30] ss:$8 sps:$4 sm:$0xff]   ;;  %v2241_v2 = vld [vmem:[#allocation4 + $0x24] ss:$8 sps:$4 sm:$0xff]  }
  0x95   :  { %1031 = vmatprep.subr.bf16.mxu1 %v2157_v3  ;;  %v2239_v3 = vld [vmem:[#allocation4 + $0x20] ss:$8 sps:$4 sm:$0xff]  }
  0x97   :  { %989 = vmatpush2.bf16.msra.mxu0 %v2152_v4  ;;  %v2244_v4 = vld [vmem:[#allocation4 + $0x14] ss:$8 sps:$4 sm:$0xff]  }
  0x98   :  { %1032 = vmatpush2.bf16.msra.mxu1 %v2155_v5  ;;  %990 = vmatprep.subr.bf16.mxu0 %v2160_v6  ;;  %v2242_v5 = vld [vmem:[#allocation4 + $0x10] ss:$8 sps:$4 sm:$0xff]   ;;  %v2247_v6 = vld [vmem:[#allocation4 + $0x4] ss:$8 sps:$4 sm:$0xff]  }
  0x99   :  { %1033 = vmatprep.subr.bf16.mxu1 %v2163_v7  ;;  %v2245_v7 = vld [vmem:[#allocation4] ss:$8 sps:$4 sm:$0xff]  }
  0x9b   :  { %991 = vmatpush2.bf16.msra.mxu0 %v2158_v8  ;;  %v2250_v8 = vld [vmem:[#allocation4 + $0xf4] ss:$8 sps:$4 sm:$0xff]  }
  0x9c   :  { %1034 = vmatpush2.bf16.msra.mxu1 %v2161_v9  ;;  %992 = vmatprep.subr.bf16.mxu0 %v2166_v10  ;;  %v2248_v9 = vld [vmem:[#allocation4 + $0xf0] ss:$8 sps:$4 sm:$0xff]   ;;  %v2253_v10 = vld [vmem:[#allocation4 + $0xe4] ss:$8 sps:$4 sm:$0xff]  }
  0x9d   :  { %1035 = vmatprep.subr.bf16.mxu1 %v2169_v11  ;;  %v2251_v11 = vld [vmem:[#allocation4 + $0xe0] ss:$8 sps:$4 sm:$0xff]  }
  0x9f   :  { %993 = vmatpush2.bf16.msra.mxu0 %v2164_v12  ;;  %v2256_v12 = vld [vmem:[#allocation4 + $0xd4] ss:$8 sps:$4 sm:$0xff]  }
  0xa0   :  { %1036 = vmatpush2.bf16.msra.mxu1 %v2167_v13  ;;  %994 = vmatprep.subr.bf16.mxu0 %v2172_v14  ;;  %v2254_v13 = vld [vmem:[#allocation4 + $0xd0] ss:$8 sps:$4 sm:$0xff]   ;;  %v2259_v14 = vld [vmem:[#allocation4 + $0xc4] ss:$8 sps:$4 sm:$0xff]  }
  0xa1   :  { %1037 = vmatprep.subr.bf16.mxu1 %v2175_v15  ;;  %v2257_v15 = vld [vmem:[#allocation4 + $0xc0] ss:$8 sps:$4 sm:$0xff]  }
  0xa3   :  { %995 = vmatpush2.bf16.msra.mxu0 %v2170_v16  ;;  %v2262_v16 = vld [vmem:[#allocation4 + $0xb4] ss:$8 sps:$4 sm:$0xff]  }
  0xa4   :  { %1038 = vmatpush2.bf16.msra.mxu1 %v2173_v17  ;;  %1260 = vmatprep.subr.bf16.mxu0 %v2178_v25  ;;  %v2260_v17 = vld [vmem:[#allocation4 + $0xb0] ss:$8 sps:$4 sm:$0xff]  }
  0xa5   :  { %1513 = vmatprep.subr.bf16.mxu1 %v2226_v57 }
  0xa6   :  { %997 = vmatmul.mubr.bf16.vlgmr.msra.gmra.mxu0 %v94_v22  ;;  %v2562_v22 = vsub.s32 1, %v229_v19 }
  0xa7   :  { %1040 = vmatmul.mubr.bf16.vlgmr.msra.gmra.mxu1 %v96_v23  ;;  %1261 = vmatpush1.bf16.msra.mxu0 %v2176_v24  ;;  %v226_v23 = vld [vmem:[%s2592_s2] sm:$0x3]  ;;  %v2567_v24 = vsub.s32 0, %v229_v19 }
  0xa8   :  { %1262 = vmatprep.subr.bf16.mxu0 %v2181_v26  ;;  %1514 = vmatpush1.bf16.msra.mxu1 %v2224_v56 }
  0xa9   :  { %1515 = vmatprep.subr.bf16.mxu1 %v2229_v58 }
  0xab   :  { %1263 = vmatpush1.bf16.msra.mxu0 %v2179_v27  ;;  %v235_v27 = vrot.slane %v226_v23, %v2562_v22 }
  0xac   :  { %1264 = vmatprep.subr.bf16.mxu0 %v2184_v28  ;;  %1516 = vmatpush1.bf16.msra.mxu1 %v2227_v59  ;;  %v231_v28 = vrot.slane %v226_v23, %v2567_v24 }
  0xad   :  { %1517 = vmatprep.subr.bf16.mxu1 %v2232_v60 }
  0xaf   :  { %1265 = vmatpush1.bf16.msra.mxu0 %v2182_v29 }
  0xb0   :  { %1266 = vmatprep.subr.bf16.mxu0 %v2187_v30  ;;  %1518 = vmatpush1.bf16.msra.mxu1 %v2230_v61 }
  0xb1   :  { %1519 = vmatprep.subr.bf16.mxu1 %v2235_v62 }
  0xb3   :  { %1267 = vmatpush1.bf16.msra.mxu0 %v2185_v31 }
  0xb4   :  { %1268 = vmatprep.subr.bf16.mxu0 %v2190_v32  ;;  %1520 = vmatpush1.bf16.msra.mxu1 %v2233_v63  ;;  %v2265_v63 = vld [vmem:[#allocation4 + $0xa4] ss:$8 sps:$4 sm:$0xff]  }
  0xb5   :  { %1521 = vmatprep.subr.bf16.mxu1 %v2238_v0  ;;  %v2263_v0 = vld [vmem:[#allocation4 + $0xa0] ss:$8 sps:$4 sm:$0xff]  }
  0xb7   :  { %1269 = vmatpush1.bf16.msra.mxu0 %v2188_v33 }
  0xb8   :  { %1270 = vmatprep.subr.bf16.mxu0 %v2193_v34  ;;  %1522 = vmatpush1.bf16.msra.mxu1 %v2236_v1  ;;  %v2268_v1 = vld [vmem:[#allocation4 + $0x94] ss:$8 sps:$4 sm:$0xff]  }
  0xb9   :  { %1523 = vmatprep.subr.bf16.mxu1 %v2241_v2  ;;  %v2266_v2 = vld [vmem:[#allocation4 + $0x90] ss:$8 sps:$4 sm:$0xff]  }
  0xbb   :  { %1271 = vmatpush1.bf16.msra.mxu0 %v2191_v35 }
  0xbc   :  { %1272 = vmatprep.subr.bf16.mxu0 %v2196_v36  ;;  %1524 = vmatpush1.bf16.msra.mxu1 %v2239_v3  ;;  %v2271_v3 = vld [vmem:[#allocation4 + $0x84] ss:$8 sps:$4 sm:$0xff]  }
  0xbd   :  { %1525 = vmatprep.subr.bf16.mxu1 %v2244_v4  ;;  %v2269_v4 = vld [vmem:[#allocation4 + $0x80] ss:$8 sps:$4 sm:$0xff]  }
  0xbf   :  { %1273 = vmatpush1.bf16.msra.mxu0 %v2194_v37 }
  0xc0   :  { %1274 = vmatprep.subr.bf16.mxu0 %v2199_v38  ;;  %1526 = vmatpush1.bf16.msra.mxu1 %v2242_v5  ;;  %v2272_v5 = vld [vmem:[#allocation6 + $0x78] sm:$0xff]  }
  0xc1   :  { %1527 = vmatprep.subr.bf16.mxu1 %v2247_v6  ;;  %v2273_v6 = vld [vmem:[#allocation6 + $0x38] sm:$0xff]  }
  0xc3   :  { %1275 = vmatpush1.bf16.msra.mxu0 %v2197_v39 }
  0xc4   :  { %1276 = vmatprep.subr.bf16.mxu0 %v2202_v40  ;;  %1528 = vmatpush1.bf16.msra.mxu1 %v2245_v7  ;;  %v2274_v7 = vld [vmem:[#allocation6 + $0x70] sm:$0xff]  }
  0xc5   :  { %1529 = vmatprep.subr.bf16.mxu1 %v2250_v8  ;;  %v2275_v8 = vld [vmem:[#allocation6 + $0x30] sm:$0xff]  }
  0xc7   :  { %1277 = vmatpush2.bf16.msra.mxu0 %v2200_v41 }
  0xc8   :  { %1278 = vmatprep.subr.bf16.mxu0 %v2205_v42  ;;  %1530 = vmatpush2.bf16.msra.mxu1 %v2248_v9  ;;  %v2276_v9 = vld [vmem:[#allocation6 + $0x68] sm:$0xff]  }
  0xc9   :  { %1531 = vmatprep.subr.bf16.mxu1 %v2253_v10  ;;  %v2277_v10 = vld [vmem:[#allocation6 + $0x28] sm:$0xff]  }
  0xcb   :  { %1279 = vmatpush2.bf16.msra.mxu0 %v2203_v43 }
  0xcc   :  { %1280 = vmatprep.subr.bf16.mxu0 %v2208_v44  ;;  %1532 = vmatpush2.bf16.msra.mxu1 %v2251_v11  ;;  %v2278_v11 = vld [vmem:[#allocation6 + $0x60] sm:$0xff]  }
  0xcd   :  { %1533 = vmatprep.subr.bf16.mxu1 %v2256_v12  ;;  %v2279_v12 = vld [vmem:[#allocation6 + $0x20] sm:$0xff]  }
  0xcf   :  { %1281 = vmatpush2.bf16.msra.mxu0 %v2206_v45 }
  0xd0   :  { %1282 = vmatprep.subr.bf16.mxu0 %v2211_v46  ;;  %1534 = vmatpush2.bf16.msra.mxu1 %v2254_v13  ;;  %v2280_v13 = vld [vmem:[#allocation6 + $0x58] sm:$0xff]  }
  0xd1   :  { %1535 = vmatprep.subr.bf16.mxu1 %v2259_v14  ;;  %v2281_v14 = vld [vmem:[#allocation6 + $0x18] sm:$0xff]  }
  0xd3   :  { %1283 = vmatpush2.bf16.msra.mxu0 %v2209_v47 }
  0xd4   :  { %1284 = vmatprep.subr.bf16.mxu0 %v2214_v48  ;;  %1536 = vmatpush2.bf16.msra.mxu1 %v2257_v15  ;;  %v1088_v15 = vld [vmem:[%s2594_s4] sm:$0x3] }
  0xd5   :  { %1537 = vmatprep.subr.bf16.mxu1 %v2262_v16  ;;  %v1093_v18 = vrot.slane %v1088_v15, %v2567_v24 }
  0xd7   :  { %1285 = vmatpush2.bf16.msra.mxu0 %v2212_v49 }
  0xd8   :  { %1286 = vmatprep.subr.bf16.mxu0 %v2217_v50  ;;  %1538 = vmatpush2.bf16.msra.mxu1 %v2260_v17  ;;  %v1097_v17 = vrot.slane %v1088_v15, %v2562_v22 }
  0xd9   :  { %1539 = vmatprep.subr.bf16.mxu1 %v2265_v63 }
  0xdb   :  { %1287 = vmatpush2.bf16.msra.mxu0 %v2215_v51 }
  0xdc   :  { %1288 = vmatprep.subr.bf16.mxu0 %v2220_v52  ;;  %1540 = vmatpush2.bf16.msra.mxu1 %v2263_v0 }
  0xdd   :  { %1541 = vmatprep.subr.bf16.mxu1 %v2268_v1 }
  0xdf   :  { %1289 = vmatpush2.bf16.msra.mxu0 %v2218_v53 }
  0xe0   :  { %1290 = vmatprep.subr.bf16.mxu0 %v2223_v54  ;;  %1542 = vmatpush2.bf16.msra.mxu1 %v2266_v2 }
  0xe1   :  { %1543 = vmatprep.subr.bf16.mxu1 %v2271_v3 }
  0xe3   :  { %1291 = vmatpush2.bf16.msra.mxu0 %v2221_v55 }
  0xe4   :  { %1544 = vmatpush2.bf16.msra.mxu1 %v2269_v4  ;;  %1955 = vmatprep.subr.bf16.mxu0 %v2272_v5 }
 0x126   :  { %v912_v20 = vpop.f32.mrf.mxu0 }
 0x127   :  { %v955_v21 = vpop.f32.mrf.mxu1  ;;  %v913_v32 = vadd.f32 %v912_v20, %v231_v28 }
 0x128   :  { %v914_v25 = vpop.f32.mrf.mxu0 }
 0x129   :  { %v957_v26 = vpop.f32.mrf.mxu1  ;;  %v915_v31 = vadd.f32 %v914_v25, %v235_v27  ;;  %v956_v40 = vadd.f32 %v955_v21, %v913_v32 }
 0x12a   :  { %v916_v29 = vpop.f32.mrf.mxu0 }
 0x12b   :  { %v959_v30 = vpop.f32.mrf.mxu1  ;;  %v917_v35 = vadd.f32 %v916_v29, %v231_v28  ;;  %v958_v38 = vadd.f32 %v957_v26, %v915_v31 }
 0x12c   :  { %v918_v33 = vpop.f32.mrf.mxu0 }
 0x12d   :  { %v961_v34 = vpop.f32.mrf.mxu1  ;;  %v919_v39 = vadd.f32 %v918_v33, %v235_v27  ;;  %v960_v43 = vadd.f32 %v959_v30, %v917_v35  ;;  %v2283_v35 = vld [vmem:[#allocation6 + $0x10] sm:$0xff]  }
 0x12f   :  { %v962_v48 = vadd.f32 %v961_v34, %v919_v39  ;;  %v2282_v34 = vld [vmem:[#allocation6 + $0x50] sm:$0xff]   ;;  %v2287_v39 = vld [vmem:[#allocation6] sm:$0xff]  }
 0x166   :  { %v998_v36 = vpop.f32.mrf.mxu0 }
 0x167   :  { %v1041_v37 = vpop.f32.mrf.mxu1  ;;  %v999_v45 = vadd.f32 %v998_v36, %v956_v40  ;;  %v2284_v36 = vld [vmem:[#allocation6 + $0x48] sm:$0xff]   ;;  %v1341_v40 = vld [vmem:[%s2596_s6] sm:$0x3] }
 0x168   :  { %v1000_v41 = vpop.f32.mrf.mxu0 }
 0x169   :  { %v1043_v42 = vpop.f32.mrf.mxu1  ;;  %v1001_v44 = vadd.f32 %v1000_v41, %v958_v38  ;;  %v1042_v54 = vadd.f32 %v1041_v37, %v999_v45  ;;  %v2285_v37 = vld [vmem:[#allocation6 + $0x8] sm:$0xff]   ;;  %v2286_v38 = vld [vmem:[#allocation6 + $0x40] sm:$0xff]  }
 0x16a   :  { %v1002_v46 = vpop.f32.mrf.mxu0 }
 0x16b   :  { %v1045_v47 = vpop.f32.mrf.mxu1  ;;  %v1003_v49 = vadd.f32 %v1002_v46, %v960_v43  ;;  %v1044_v51 = vadd.f32 %v1043_v42, %v1001_v44  ;;  %v1050_v60 = vmax.f32 %v1042_v54, 0.0  ;;  %v1350_v42 = vrot.slane %v1341_v40, %v2562_v22  ;;  %v1938_v22 = vld [vmem:[%s2598_s8] ss:$0 sm:$0xff] }
 0x16c   :  { %v1004_v50 = vpop.f32.mrf.mxu0  ;;  %v1346_v43 = vrot.slane %v1341_v40, %v2567_v24 }
 0x16d   :  { %v1046_v52 = vadd.f32 %v1045_v47, %v1003_v49  ;;  %v1005_v53 = vadd.f32 %v1004_v50, %v962_v48  ;;  %v1047_v55 = vpop.f32.mrf.mxu1  ;;  %v1051_v58 = vmax.f32 %v1044_v51, 0.0 }
 0x16f   :  { %v1048_v56 = vadd.f32 %v1047_v55, %v1005_v53  ;;  %v1052_v57 = vmax.f32 %v1046_v52, 0.0 }
 0x171   :  { %v1053_v59 = vmax.f32 %v1048_v56, 0.0  ;;  %v1054_v62 = vpack.c.bf16 %v1052_v57, %v1050_v60 }
 0x173   :  { %v1055_v61 = vpack.c.bf16 %v1053_v59, %v1051_v58 }
 0x175   :  { %1292 = vmatprep.mubr.bf16.mxu0 %v1055_v61 }
 0x176   :  { %1293 = vmatmul.mubr.bf16.vlgmr.msra.gmra.mxu0 %v1054_v62 }
 0x177   :  { %1956 = vmatpush3.bf16.msra.mxu0 %v2273_v6 }
 0x178   :  { %1957 = vmatprep.subr.bf16.mxu0 %v2274_v7 }
 0x17b   :  { %1958 = vmatpush3.bf16.msra.mxu0 %v2275_v8 }
 0x17c   :  { %1959 = vmatprep.subr.bf16.mxu0 %v2276_v9 }
 0x17f   :  { %1960 = vmatpush3.bf16.msra.mxu0 %v2277_v10 }
 0x180   :  { %1961 = vmatprep.subr.bf16.mxu0 %v2278_v11 }
 0x183   :  { %1962 = vmatpush3.bf16.msra.mxu0 %v2279_v12 }
 0x184   :  { %1963 = vmatprep.subr.bf16.mxu0 %v2280_v13 }
 0x187   :  { %1964 = vmatpush3.bf16.msra.mxu0 %v2281_v14 }
 0x188   :  { %1965 = vmatprep.subr.bf16.mxu0 %v2282_v34 }
 0x18b   :  { %1966 = vmatpush3.bf16.msra.mxu0 %v2283_v35 }
 0x18c   :  { %1967 = vmatprep.subr.bf16.mxu0 %v2284_v36 }
 0x18f   :  { %1968 = vmatpush3.bf16.msra.mxu0 %v2285_v37 }
 0x190   :  { %1969 = vmatprep.subr.bf16.mxu0 %v2286_v38 }
 0x193   :  { %1970 = vmatpush3.bf16.msra.mxu0 %v2287_v39 }
 0x236   :  { %v1294_v16 = vpop.f32.mrf.mxu0 }
 0x237   :  { %v1295_v25 = vadd.f32 %v1294_v16, %v1093_v18 }
 0x238   :  { %v1296_v19 = vpop.f32.mrf.mxu0 }
 0x239   :  { %v1297_v21 = vadd.f32 %v1296_v19, %v1097_v17  ;;  %v1303_v31 = vmax.f32 %v1295_v25, 0.0 }
 0x23a   :  { %v1298_v20 = vpop.f32.mrf.mxu0 }
 0x23b   :  { %v1299_v23 = vadd.f32 %v1298_v20, %v1093_v18  ;;  %v1304_v29 = vmax.f32 %v1297_v21, 0.0 }
 0x23c   :  { %v1300_v26 = vpop.f32.mrf.mxu0 }
 0x23d   :  { %v1301_v27 = vadd.f32 %v1300_v26, %v1097_v17  ;;  %v1305_v28 = vmax.f32 %v1299_v23, 0.0 }
 0x23f   :  { %v1306_v30 = vmax.f32 %v1301_v27, 0.0  ;;  %v1307_v33 = vpack.c.bf16 %v1305_v28, %v1303_v31 }
 0x241   :  { %v1308_v32 = vpack.c.bf16 %v1306_v30, %v1304_v29 }
 0x243   :  { %1545 = vmatprep.mubr.bf16.mxu1 %v1308_v32 }
 0x244   :  { %1546 = vmatmul.mubr.bf16.vlgmr.msra.gmra.mxu1 %v1307_v33 }
 0x304   :  { %v1547_v41 = vpop.f32.mrf.mxu1 }
 0x305   :  { %v1548_v48 = vadd.f32 %v1547_v41, %v1346_v43 }
 0x306   :  { %v1549_v44 = vpop.f32.mrf.mxu1 }
 0x307   :  { %v1550_v46 = vadd.f32 %v1549_v44, %v1350_v42  ;;  %v1556_v54 = vmax.f32 %v1548_v48, 0.0 }
 0x308   :  { %v1551_v45 = vpop.f32.mrf.mxu1 }
 0x309   :  { %v1552_v47 = vadd.f32 %v1551_v45, %v1346_v43  ;;  %v1557_v52 = vmax.f32 %v1550_v46, 0.0 }
 0x30a   :  { %v1553_v49 = vpop.f32.mrf.mxu1 }
 0x30b   :  { %v1554_v50 = vadd.f32 %v1553_v49, %v1350_v42  ;;  %v1558_v51 = vmax.f32 %v1552_v47, 0.0 }
 0x30d   :  { %v1559_v53 = vmax.f32 %v1554_v50, 0.0  ;;  %v1560_v56 = vpack.c.bf16 %v1558_v51, %v1556_v54 }
 0x30f   :  { %v1561_v55 = vpack.c.bf16 %v1559_v53, %v1557_v52 }
 0x311   :  { %1729 = vmatprep.mubr.bf16.mxu0 %v1561_v55 }
 0x312   :  { %1730 = vmatmul.mubr.bf16.vlgmr.msra.gmra.mxu0 %v1560_v56 }
 0x3d2   :  { %v1971_v57 = vpop.f32.mrf.mxu0 }
 0x3d4   :  { %v1972_v24 = vpop.f32.mrf.mxu0 }
 0x3d5   :  { %v1973_v58 = vadd.f32 %v1972_v24, %v1971_v57 }
 0x3d6   :  { %v1974_v59 = vpop.f32.mrf.mxu0 }
 0x3d7   :  { %v1732_v60 = vadd.f32 %v1973_v58, %v1938_v22 }
 0x3d8   :  { %v1975_v61 = vpop.f32.mrf.mxu0 }
 0x3d9   :  { %1738 = vst [vmem:[%s2599_s9] sm:$0xff] %v1732_v60  ;;  %v1976_v62 = vadd.f32 %v1975_v61, %v1974_v59 }
 0x3db   :  { %v1735_v63 = vadd.f32 %v1976_v62, %v1938_v22 }
 0x3dd   :  { %1739 = vst [vmem:[%s2599_s9 + $0x8] sm:$0xff] %v1735_v63 }
 0x3de   :  { %1744 = vsyncpa [#allocation3], 1 }
 0x3df   :  { %1745 = vsyncpa [#allocation5], 1 }

</bundles_post_ra>
